<compile_context>
chip_gen: v7x
topology: tpu7x:2x2x1
jax: 0.10.0
libtpu: 0.0.40
codegen_flags: <defaults>
</compile_context>

<pallas_src>
import functools
import numpy as np
import jax
import jax.numpy as jnp
from jax.experimental import pallas as pl
from jax.experimental.pallas import tpu as pltpu

TIMESTEPS = 1000
OFFSET_NOISE_STRENGTH = 0.1


# ---------------- schedule (glue, matches linear_beta_schedule) ----------------
def linear_beta_schedule(timesteps, beta_start=0.0001, beta_end=0.002):
    scale = 1000.0 / timesteps
    return np.linspace(beta_start * scale, beta_end * scale, timesteps, dtype=np.float64)


def make_schedule_buffers(timesteps=TIMESTEPS):
    betas = linear_beta_schedule(timesteps)
    alphas = 1.0 - betas
    alphas_cumprod = np.cumprod(alphas, axis=0)
    sqrt_alphas_cumprod = np.sqrt(alphas_cumprod).astype(np.float32)
    sqrt_one_minus_alphas_cumprod = np.sqrt(1.0 - alphas_cumprod).astype(np.float32)
    return jnp.asarray(sqrt_alphas_cumprod), jnp.asarray(sqrt_one_minus_alphas_cumprod)


def _pick_batch_block(B, C, HW, min_grid=2, max_block_bytes=2 << 20):
    """Largest divisor of B that keeps the grid extent G=B//bb >= min_grid (so both v7x
    TensorCores get work; neutral on v5e/v6e) and the per-input block under
    max_block_bytes (v5e's default scoped VMEM is 16 MiB and the two big inputs are
    double-buffered).  B=2 -> bb=1, G=2."""
    best = 1
    for bb in range(1, B + 1):
        if B % bb:
            continue
        if bb * C * HW * 4 > max_block_bytes:
            break
        if B // bb >= min_grid:
            best = bb
    return best


# ---------------- Pallas kernel ----------------
def diffusion_loss_kernel(
    # scalar-prefetch refs (SMEM): per-batch gathered schedule scalars
    sac_ref, somac_ref,
    # tensor inputs (VMEM tiles)
    x0_ref, noise_ref, off_ref, w_ref, bias_ref,
    # output: per-lane partial sum of squared error for this step, shape (1, 1, HW)
    out_ref,
    *, batch_block, hw,
):
    g = pl.program_id(0)

    w = w_ref[...]          # [C, C]  1x1-conv channel mixer
    bias = bias_ref[...]    # [C, 1]

    acc = None
    for j in range(batch_block):                     # static, tiny (1 at test shapes)
        x0 = x0_ref[j]                               # [C, HW] static view
        noise = noise_ref[j]                         # [C, HW]
        # offset noise: scale the tiny [C,1] block, then lane-broadcast
        off = OFFSET_NOISE_STRENGTH * off_ref[j]     # [C, 1]
        noise_tot = noise + off                      # [C, HW]

        # per-batch schedule scalars, splatted from SMEM
        s1 = sac_ref[g * batch_block + j]            # sqrt_alphas_cumprod[t]
        s2 = somac_ref[g * batch_block + j]          # sqrt_one_minus_alphas_cumprod[t]

        # forward diffusion sample
        x = s1 * x0 + s2 * noise_tot                 # [C, HW]

        # synthetic UNet stand-in: 1x1 conv over channels + bias
        out = jnp.dot(w, x, preferred_element_type=jnp.float32) + bias

        # MSE numerator (pred_noise objective)
        d = out - noise_tot
        d2 = d * d
        acc = d2 if acc is None else acc + d2

    # per-lane partial sums (sublane/channel reduce only); final reduce in wrapper
    out_ref[0] = jnp.sum(acc, axis=0, keepdims=True)  # (1, HW)


# ---------------- wrapper ----------------
def gaussian_diffusion_forward(x_0, t, noise, offset_noise, w, bias,
                               sqrt_alphas_cumprod, sqrt_one_minus_alphas_cumprod,
                               batch_block=None):
    """x_0, noise: [B, C, H, W] float32 (NCHW); offset_noise: [B, C, 1, 1];
    t: [B] int32; w: [C, C]; bias: [C, 1]. Returns scalar mean MSE loss."""
    B, C, H, W = x_0.shape
    HW = H * W
    if batch_block is None:
        batch_block = _pick_batch_block(B, C, HW)
    assert B % batch_block == 0
    G = B // batch_block

    # free reshapes only — no transposes, no extra HBM round-trip
    x0_f = x_0.reshape(B, C, HW)
    noise_f = noise.reshape(B, C, HW)
    off_f = offset_noise.reshape(B, C, 1)

    # gather the B schedule scalars in the wrapper; tables never enter the kernel
    sac_t = sqrt_alphas_cumprod[t]                     # (B,) f32
    somac_t = sqrt_one_minus_alphas_cumprod[t]         # (B,) f32

    grid_spec = pltpu.PrefetchScalarGridSpec(
        num_scalar_prefetch=2,                         # sac_t, somac_t -> SMEM
        grid=(G,),
        in_specs=[
            pl.BlockSpec((batch_block, C, HW), lambda g, *_: (g, 0, 0)),  # x_0
            pl.BlockSpec((batch_block, C, HW), lambda g, *_: (g, 0, 0)),  # noise
            pl.BlockSpec((batch_block, C, 1), lambda g, *_: (g, 0, 0)),   # offset noise
            pl.BlockSpec((C, C), lambda g, *_: (0, 0)),                   # 1x1 conv weight
            pl.BlockSpec((C, 1), lambda g, *_: (0, 0)),                   # bias
        ],
        out_specs=pl.BlockSpec((1, 1, HW), lambda g, *_: (g, 0, 0)),      # per-lane partials
    )

    kernel = functools.partial(diffusion_loss_kernel, batch_block=batch_block, hw=HW)
    partials = pl.pallas_call(
        kernel,
        out_shape=jax.ShapeDtypeStruct((G, 1, HW), jnp.float32),
        grid_spec=grid_spec,
        compiler_params=pltpu.CompilerParams(dimension_semantics=("parallel",)),
    )(sac_t, somac_t, x0_f, noise_f, off_f, w, bias)

    # final (tiny) reduce + mean in the wrapper
    return jnp.sum(partials) / jnp.float32(B * C * HW)


# ---------------- reference (pure JAX) ----------------
def reference_forward(x_0, t, noise, offset_noise, w, bias, sac, somac):
    B, C, H, W = x_0.shape
    noise_tot = noise + OFFSET_NOISE_STRENGTH * offset_noise      # broadcast (B,C,1,1)
    s1 = sac[t][:, None, None, None]
    s2 = somac[t][:, None, None, None]
    x = s1 * x_0 + s2 * noise_tot
    xf = x.reshape(B, C, H * W)
    out = jnp.einsum("oc,bcs->bos", w, xf) + bias[None, :, :]
    tgt = noise_tot.reshape(B, C, H * W)
    return jnp.mean((out - tgt) ** 2)


if __name__ == "__main__":
    B, C, H, W = 2, 8, 16, 16

    key = jax.random.PRNGKey(0)
    k1, k2, k3, k4 = jax.random.split(key, 4)
    x_0 = jax.random.normal(k1, (B, C, H, W), dtype=jnp.float32)
    t = jax.random.randint(k2, (B,), 0, TIMESTEPS, dtype=jnp.int32)
    noise = jax.random.normal(k3, (B, C, H, W), dtype=jnp.float32)
    offset_noise = jax.random.normal(k4, (B, C, 1, 1), dtype=jnp.float32)

    # deterministic synthetic model parameters (1x1 conv channel mixer + bias)
    w = (jnp.arange(C * C, dtype=jnp.float32).reshape(C, C) / (C * C) - 0.4)
    bias = 0.01 * jnp.arange(C, dtype=jnp.float32).reshape(C, 1)

    sac, somac = make_schedule_buffers(TIMESTEPS)

    loss = gaussian_diffusion_forward(x_0, t, noise, offset_noise, w, bias, sac, somac)
    loss = jax.block_until_ready(loss)

    ref = reference_forward(x_0, t, noise, offset_noise, w, bias, sac, somac)
    assert jnp.allclose(loss, ref, rtol=1e-4, atol=1e-5), (loss, ref)

    print("KERNEL_OK")
</pallas_src>

<mosaic_0001>
module attributes {stable_mosaic.version = 11 : i64} {
  func.func @diffusion_loss_kernel(%arg0: i32, %arg1: memref<2xf32, #tpu.memory_space<smem>>, %arg2: memref<2xf32, #tpu.memory_space<smem>>, %arg3: memref<1x8x256xf32, #tpu.memory_space<vmem>>, %arg4: memref<1x8x256xf32, #tpu.memory_space<vmem>>, %arg5: memref<1x8x1xf32, #tpu.memory_space<vmem>>, %arg6: memref<8x8xf32, #tpu.memory_space<vmem>>, %arg7: memref<8x1xf32, #tpu.memory_space<vmem>>, %arg8: memref<1x1x256xf32, #tpu.memory_space<vmem>>) attributes {dimension_semantics = [#tpu.dimension_semantics<parallel>], iteration_bounds = array<i64: 2>, scalar_prefetch = 2 : i64, scratch_operands = 0 : i64, tpu.core_type = #tpu.core_type<tc>, window_params = [{transform_indices = @transform_0, window_bounds = array<i64: 1, 8, 256>}, {transform_indices = @transform_1, window_bounds = array<i64: 1, 8, 256>}, {transform_indices = @transform_2, window_bounds = array<i64: 1, 8, 1>}, {pipeline_mode = #tpu.pipeline_mode<synchronous>, transform_indices = @transform_3, window_bounds = array<i64: 8, 8>}, {pipeline_mode = #tpu.pipeline_mode<synchronous>, transform_indices = @transform_4, window_bounds = array<i64: 8, 1>}, {transform_indices = @transform_5, window_bounds = array<i64: 1, 1, 256>}]} {
    %c0 = arith.constant 0 : index
    %c0_0 = arith.constant 0 : index
    %0 = vector.load %arg6[%c0, %c0_0] : memref<8x8xf32, #tpu.memory_space<vmem>>, vector<8x8xf32>
    %c0_1 = arith.constant 0 : index
    %c0_2 = arith.constant 0 : index
    %1 = vector.load %arg7[%c0_1, %c0_2] : memref<8x1xf32, #tpu.memory_space<vmem>>, vector<8x1xf32>
    %c0_3 = arith.constant 0 : index
    %c0_4 = arith.constant 0 : index
    %c0_5 = arith.constant 0 : index
    %2 = vector.load %arg3[%c0_3, %c0_4, %c0_5] : memref<1x8x256xf32, #tpu.memory_space<vmem>>, vector<1x8x256xf32>
    %3 = vector.shape_cast %2 : vector<1x8x256xf32> to vector<8x256xf32>
    %c0_6 = arith.constant 0 : index
    %c0_7 = arith.constant 0 : index
    %c0_8 = arith.constant 0 : index
    %4 = vector.load %arg4[%c0_6, %c0_7, %c0_8] : memref<1x8x256xf32, #tpu.memory_space<vmem>>, vector<1x8x256xf32>
    %5 = vector.shape_cast %4 : vector<1x8x256xf32> to vector<8x256xf32>
    %c0_9 = arith.constant 0 : index
    %c0_10 = arith.constant 0 : index
    %c0_11 = arith.constant 0 : index
    %6 = vector.load %arg5[%c0_9, %c0_10, %c0_11] : memref<1x8x1xf32, #tpu.memory_space<vmem>>, vector<1x8x1xf32>
    %7 = vector.shape_cast %6 : vector<1x8x1xf32> to vector<8x1xf32>
    %cst = arith.constant 1.000000e-01 : f32
    %8 = vector.broadcast %cst : f32 to vector<8x1xf32>
    %9 = arith.mulf %8, %7 : vector<8x1xf32>
    %10 = vector.broadcast %9 : vector<8x1xf32> to vector<8x256xf32>
    %11 = arith.addf %5, %10 : vector<8x256xf32>
    %c1_i32 = arith.constant 1 : i32
    %12 = arith.muli %arg0, %c1_i32 : i32
    %c0_i32 = arith.constant 0 : i32
    %13 = arith.addi %12, %c0_i32 : i32
    %14 = arith.index_cast %13 : i32 to index
    %15 = memref.load %arg1[%14] : memref<2xf32, #tpu.memory_space<smem>>
    %c1_i32_12 = arith.constant 1 : i32
    %16 = arith.muli %arg0, %c1_i32_12 : i32
    %c0_i32_13 = arith.constant 0 : i32
    %17 = arith.addi %16, %c0_i32_13 : i32
    %18 = arith.index_cast %17 : i32 to index
    %19 = memref.load %arg2[%18] : memref<2xf32, #tpu.memory_space<smem>>
    %20 = vector.broadcast %15 : f32 to vector<8x256xf32>
    %21 = arith.mulf %20, %3 : vector<8x256xf32>
    %22 = vector.broadcast %19 : f32 to vector<8x256xf32>
    %23 = arith.mulf %22, %11 : vector<8x256xf32>
    %24 = arith.addf %21, %23 : vector<8x256xf32>
    %cst_14 = arith.constant dense<0.000000e+00> : vector<8x256xf32>
    %25 = tpu.matmul %0, %24, %cst_14 {dimension_numbers = #tpu.dot_dimension_numbers<[1], [0], [0], [1], [0, 0, 1, 1], [], []>} : vector<8x8xf32>, vector<8x256xf32>, vector<8x256xf32> -> vector<8x256xf32>
    %26 = vector.broadcast %1 : vector<8x1xf32> to vector<8x256xf32>
    %27 = arith.addf %25, %26 : vector<8x256xf32>
    %28 = arith.subf %27, %11 : vector<8x256xf32>
    %29 = arith.mulf %28, %28 : vector<8x256xf32>
    %cst_15 = arith.constant dense<0.000000e+00> : vector<256xf32>
    %30 = vector.multi_reduction <add>, %29, %cst_15 [0] : vector<8x256xf32> to vector<256xf32>
    %31 = vector.shape_cast %30 : vector<256xf32> to vector<1x256xf32>
    %c0_16 = arith.constant 0 : index
    %c0_17 = arith.constant 0 : index
    %c0_18 = arith.constant 0 : index
    %32 = vector.load %arg8[%c0_16, %c0_17, %c0_18] : memref<1x1x256xf32, #tpu.memory_space<vmem>>, vector<1x1x256xf32>
    %33 = vector.shape_cast %32 : vector<1x1x256xf32> to vector<1x256xf32>
    %34 = vector.shape_cast %31 : vector<1x256xf32> to vector<1x1x256xf32>
    tpu.vector_store %arg8[%c0_16, %c0_17, %c0_18], %34 {strides = array<i32>} : memref<1x1x256xf32, #tpu.memory_space<vmem>>, vector<1x1x256xf32>,
    return
  }
  func.func @transform_0(%arg0: i32, %arg1: memref<2xf32, #tpu.memory_space<smem>>, %arg2: memref<2xf32, #tpu.memory_space<smem>>) -> (i32, i32, i32) {
    %c0_i32 = arith.constant 0 : i32
    %c0_i32_0 = arith.constant 0 : i32
    %c0_i32_1 = arith.constant 0 : i32
    return %arg0, %c0_i32, %c0_i32_0 : i32, i32, i32
  }
  func.func @transform_1(%arg0: i32, %arg1: memref<2xf32, #tpu.memory_space<smem>>, %arg2: memref<2xf32, #tpu.memory_space<smem>>) -> (i32, i32, i32) {
    %c0_i32 = arith.constant 0 : i32
    %c0_i32_0 = arith.constant 0 : i32
    %c0_i32_1 = arith.constant 0 : i32
    return %arg0, %c0_i32, %c0_i32_0 : i32, i32, i32
  }
  func.func @transform_2(%arg0: i32, %arg1: memref<2xf32, #tpu.memory_space<smem>>, %arg2: memref<2xf32, #tpu.memory_space<smem>>) -> (i32, i32, i32) {
    %c0_i32 = arith.constant 0 : i32
    %c0_i32_0 = arith.constant 0 : i32
    %c0_i32_1 = arith.constant 0 : i32
    return %arg0, %c0_i32, %c0_i32_0 : i32, i32, i32
  }
  func.func @transform_3(%arg0: i32, %arg1: memref<2xf32, #tpu.memory_space<smem>>, %arg2: memref<2xf32, #tpu.memory_space<smem>>) -> (i32, i32) {
    %c0_i32 = arith.constant 0 : i32
    %c0_i32_0 = arith.constant 0 : i32
    %c0_i32_1 = arith.constant 0 : i32
    return %c0_i32, %c0_i32_0 : i32, i32
  }
  func.func @transform_4(%arg0: i32, %arg1: memref<2xf32, #tpu.memory_space<smem>>, %arg2: memref<2xf32, #tpu.memory_space<smem>>) -> (i32, i32) {
    %c0_i32 = arith.constant 0 : i32
    %c0_i32_0 = arith.constant 0 : i32
    %c0_i32_1 = arith.constant 0 : i32
    return %c0_i32, %c0_i32_0 : i32, i32
  }
  func.func @transform_5(%arg0: i32, %arg1: memref<2xf32, #tpu.memory_space<smem>>, %arg2: memref<2xf32, #tpu.memory_space<smem>>) -> (i32, i32, i32) {
    %c0_i32 = arith.constant 0 : i32
    %c0_i32_0 = arith.constant 0 : i32
    %c0_i32_1 = arith.constant 0 : i32
    return %arg0, %c0_i32, %c0_i32_0 : i32, i32, i32
  }
}

</mosaic_0001>

<bundles_post_ra>
// kernel: tpu_custom_call.1
= control target key start
LH: loop header
LB: loop body
LE: loop exit
PB: predicated region body
PF: predicated region fallthrough
CT: control target
= control target key end

     0   :  { %s981_s0 = inlined_call_operand.hbm [shape: f32[2], index: 0, kind: input, shape index: {}]   ;;  %s982_s2 = inlined_call_operand.vmem [shape: f32[2,8,256], index: 2, kind: input, shape index: {}]   ;;  %s983_s3 = inlined_call_operand.hbm [shape: f32[2,8,256], index: 3, kind: input, shape index: {}]   ;;  %s984_s4 = inlined_call_operand.vmem [shape: f32[2,8,1], index: 4, kind: input, shape index: {}]   ;;  %s985_s5 = inlined_call_operand.vmem [shape: f32[8,8], index: 5, kind: input, shape index: {}]   ;;  %s986_s6 = inlined_call_operand.vmem [shape: f32[8,1], index: 6, kind: input, shape index: {}]   ;;  %s987_s7 = inlined_call_operand.hbm [shape: f32[2,1,256], index: 7, kind: output, shape index: {}]   ;;  %s988_s1 = inlined_call_operand.hbm [shape: f32[2], index: 1, kind: input, shape index: {}]  }
   0x1   :  { %s612_s26 = scalar_lea.hbm %s981_s0, 16 }
   0x2   :  { %p613_p0 = scmp.ne.s32.totalorder %s981_s0, %s612_s26  ;;  %p616_p1 = scmp.lt.u32.totalorder %s612_s26, %s981_s0 }
   0x4   :  { %p618_p2 = pnand %p616_p1, %p613_p0 }
   0x6   :  { %621 = shalt.err (!%p618_p2)  }
   0x7   :  { %s732_s8 = smov [#allocation3]   ;;  %s622_s13 = scalar_lea.hbm %s988_s1, 16 }
   0x8   :  { %13 = dma.hbm_to_smem %s981_s0, 16, %s732_s8, [#allocation2] }
   0x9   :  { %p623_p3 = scmp.ne.s32.totalorder %s988_s1, %s622_s13  ;;  %p626_p4 = scmp.lt.u32.totalorder %s622_s13, %s988_s1 }
   0xb   :  { %p628_p5 = pnand %p626_p4, %p623_p3 }
   0xd   :  { %631 = shalt.err (!%p628_p5)  }
   0xe   :  { %s733_s18 = smov [#allocation4]  }
   0xf   :  { %15 = dma.hbm_to_smem %s988_s1, 16, %s733_s18, [#allocation2] }
  0x10   :  { %706 = dma.done.wait [#allocation2], 32 }
  0x11   :  { %707 = vsyncadd [#allocation2], 4294967264 }
  0x12   :  { %17 = sfence }
  0x13   :  { %18 = vsyncpa [#allocation6], 0 }
  0x14   :  { %20 = vsyncpa [#allocation6 + $0x1], 0 }
  0x15   :  { %21 = vsyncpa [#allocation7], 0 }
  0x16   :  { %23 = vsyncpa [#allocation7 + $0x1], 0  ;;  %s803_s0 = smov 0   ;;  %s805_s21 = smov 0  }
  0x17   :  { %s807_s22 = smov 0   ;;  %s809_s23 = smov 0  }
  0x18 LB: > { %s824_s1 = sadd.s32 4294967295, %s730_s23   ;;  %s539_s24 = sadd.s32 4294967294, %s730_s23   ;;  %s730_s23 = sphi %s809_s23, %s1003_s23   ;;  %s726_s22 = sphi %s807_s22, %s1002_s22   ;;  %s722_s21 = sphi %s805_s21, %s1001_s21   ;;  %s718_s0 = sphi %s803_s0, %s1000_s0  }
  0x19   : > { %s828_s25 = sadd.s32 1, %s730_s23   ;;  %s62_s26 = sadd.s32 1, %s726_s22 }
  0x1a   : > { %s59_s27 = ssub.s32 %s730_s23, %s828_s25  ;;  %p69_p6 = scmp.ne.s32.totalorder %s726_s22, %s722_s21 }
  0x1b   : > { %p60_p7 = scmp.eq.s32.totalorder %s59_s27, 0  ;;  %p70_p8 = scmp.eq.s32.totalorder %s730_s23, 0 }
  0x1c   : > { %p75_p9 = scmp.ne.s32.totalorder %s722_s21, %s718_s0  ;;  %p76_p10 = scmp.eq.s32.totalorder %s824_s1, 0 }
  0x1d   : > { %s840_s28 = scalar_select %p60_p7, %s726_s22, %s62_s26  }
  0x1e   : > { %p842_p11 = por %p70_p8, %p69_p6  ;;  %p846_p12 = por %p76_p10, %p75_p9 }
  0x1f   : > { %p167_p13 = scmp.eq.s32.totalorder %s824_s1, 1  ;;  %p173_p0 = scmp.eq.s32.totalorder %s539_s24, 1 }
  0x20   : > { %p572_p2 = scmp.lt.s32.totalorder %s730_s23, 2  ;;  %s207_s10 = sand.u32 1, %s726_s22  }
  0x21   : > { %p853_p3 = por %p167_p13, %p69_p6  ;;  %p857_p4 = por %p173_p0, %p75_p9 }
  0x22   : > { %s557_s11 = sshll.u32 %s730_s23, 8  ;;  %s542_s12 = sshll.u32 %s207_s10, 4 }
  0x23   : > { %s992_s8 = scalar_select %p853_p3, 1, 0 }
  0x24   : > { %s993_s9 = scalar_select %p857_p4, 1, 0 }
  0x25   : > { %s866_s15 = scalar_lea.hbm %s983_s3, %s557_s11  ;;  %s211_s16 = scalar_lea.vmem [#allocation5], %s542_s12 }
  0x26   : > { %s219_s17 = sshll.u32 %s211_s16, 4  ;;  %p870_p5 = pnand %p572_p2, %p842_p11  ;;  %s874_s17 = int_to_ptr.vmem [resolvable:$true] %s219_s17 }
  0x27   : > { %s208_s19 = scalar_lea.sflag [#allocation6], %s207_s10  ;;  %s632_s20 = scalar_lea.hbm %s866_s15, 256 }
  0x28   : > { %p633_p8 = scmp.ne.s32.totalorder %s866_s15, %s632_s20  ;;  %p634_p9 = pneg %p870_p5 }
  0x29   : > { %s637_s27 = scalar_lea.hbm %s983_s3, 512  ;;  %p638_p11 = scmp.lt.u32.totalorder %s866_s15, %s983_s3 }
  0x2a   : > { %p635_p10 = pnand %p634_p9, %p633_p8  ;;  %p639_p0 = scmp.lt.u32.totalorder %s637_s27, %s632_s20 }
  0x2b   : > { %p641_p1 = scmp.lt.u32.totalorder %s632_s20, %s866_s15 }
  0x2c   : > { %p636_p13 = pneg %p635_p10  ;;  %p640_p2 = por %p639_p0, %p638_p11 }
  0x2e   : > { %p642_p6 = por %p641_p1, %p640_p2 }
  0x30   : > { %p643_p7 = pnand %p642_p6, %p636_p13 }
  0x32   : > { %646 = shalt.err (!%p643_p7)
}
  0x33   : > { %s647_s10 = scalar_lea.vmem %s874_s17, 256  ;;  %s734_s12 = smov [#allocation5]  }
  0x34   : > { %p648_p8 = scmp.ne.s32.totalorder %s874_s17, %s647_s10  ;;  %s652_s13 = sshll.u32 %s734_s12, 4  ;;  %s653_s13 = int_to_ptr.vmem [resolvable:$false] %s652_s13 }
  0x35   : > { %s654_s14 = scalar_lea.vmem %s653_s13, 512  ;;  %p655_p3 = scmp.lt.s32.totalorder %s874_s17, %s653_s13 }
  0x36   : > { %p650_p10 = pnand %p648_p8, %p634_p9  ;;  %p656_p11 = scmp.lt.s32.totalorder %s654_s14, %s647_s10 }
  0x38   : > { %p651_p4 = pneg %p650_p10  ;;  %p657_p0 = por %p656_p11, %p655_p3 }
  0x3a   : > { %p658_p1 = pnand %p657_p0, %p651_p4 }
  0x3c   : > { %661 = shalt.err (!%p658_p1)
}
  0x3d   : > { %567 = dma.hbm_to_vmem [thread:$0]  (!%p870_p5), %s866_s15, 256, %s874_s17, %s208_s19  }
  0x3e   : > { %p995_p6 = scmp.lt.s32.totalorder %s730_s23, 3  ;;  %p996_p7 = scmp.ge.s32.totalorder %s730_s23, 1 }
  0x40   : > { %p232_p9 = pnand %p996_p7, %p995_p6 }
  0x41   : > { %s908_s16 = sand.u32 (!%p232_p9), 1, %s722_s21  }
  0x42   : > { %235 = sbr.rel (%p232_p9) target bundleno = 470 (0x1d6), region = 40  ;;  %s546_s20 = sshll.u32 (!%p232_p9), %s908_s16, 4 }
  0x43   : > { %s238_s24 = scalar_lea.sflag (!%p232_p9), [#allocation6], %s908_s16  ;;  %s241_s26 = scalar_lea.vmem (!%p232_p9), [#allocation5], %s546_s20 }
  0x49   : > { %709 = dma.done.wait (%p846_p12), %s238_s24, 256  }
  0x4a   : > { %711 = vsyncadd (%p846_p12), %s238_s24, 4294967040  ;;  %p277_p3 = scmp.lt.s32.totalorder %s824_s1, 1  ;;  %v735_v0 = vmov 0   ;;  %v287_v3 = vld [vmem:[%s986_s6] sm:$0xff]  ;;  %v736_v4 = vmov 0.0   ;;  %s301_s30 = sld [smem:[#allocation3 + %s824_s1]]  ;;  %v413_v36 = vlaneseq }
  0x4b   : > { %611 = vset.pattern.permute.xlu0 %v735_v0  ;;  %384 = vmatprep.mubr.f32.mxu0 %v736_v4  ;;  %s302_s12 = sld [smem:[#allocation4 + %s824_s1]]  ;;  %v290_v5 = vld [vmem:[%s241_s26] sm:$0xff]  ;;  %v291_v6 = vld [vmem:[%s241_s26 + $0x8] sm:$0xff]  ;;  %vm316_vm0 = vcmask 64512   ;;  %v737_v34 = vmov 1966171168  }
  0x4c   : > { %s278_s15 = scalar_select %p277_p3, %s824_s1, 1  ;;  %v286_v20 = vld [vmem:[%s985_s5] sm:$0xff]  ;;  %v411_v35 = vunpack.c.l.s4 %v737_v34  ;;  %v414_v42 = vshrl.u32 %v413_v36, 7  ;;  %vm427_vm1 = vcmp.lt.s32.totalorder %v413_v36, 256 }
  0x4d   : > { %s547_s26 = sshll.u32 %s908_s16, 1  ;;  %p997_p4 = scmp.ne.s32.totalorder %s992_s8, 0 }
  0x4e   : > { %s550_s17 = sshll.u32 %s278_s15, 3  ;;  %s558_s10 = sshll.u32 %s278_s15, 4  ;;  %v412_v41 = vunpack.c.0.s8 %v411_v35 }
  0x4f   : > { %s285_s27 = scalar_lea.vmem %s984_s4, %s550_s17  ;;  %s281_s20 = scalar_lea.vmem %s982_s2, %s558_s10 }
  0x50   : > { %v292_v1 = vld [vmem:[%s285_s27] sm:$0xff]  ;;  %v289_v7 = vld [vmem:[%s281_s20 + $0x8] sm:$0xff]  ;;  %v303_v8 = vstv %s301_s30  ;;  %v415_v47 = vsub.s32 %v412_v41, %v414_v42  ;;  %s559_s17 = sshll.u32 %s824_s1, 5  ;;  %s276_s18 = scalar_lea.vmem [#allocation8], %s547_s26 }
  0x51   : > { %v293_v2 = vmul.f32 0.1, %v292_v1  ;;  %v288_v9 = vld [vmem:[%s281_s20] sm:$0xff]  ;;  %v306_v11 = vstv %s302_s12  ;;  %v305_v14 = vmul.f32 %v303_v8, %v289_v7  ;;  %s445_s19 = sshll.u32 %s276_s18, 4  ;;  %s937_s11 = scalar_lea.hbm %s987_s7, %s559_s17  ;;  %s939_s19 = int_to_ptr.vmem [resolvable:$true] %s445_s19 }
  0x52   : > { %v304_v15 = vmul.f32 %v303_v8, %v288_v9  ;;  %s431_s30 = scalar_lea.sflag [#allocation7], %s908_s16  ;;  %s662_s10 = scalar_lea.vmem %s939_s19, 32 }
  0x53   : > { %296 = vperm.xlu0 %611, %v293_v2   ;;  %p663_p12 = scmp.ne.s32.totalorder %s939_s19, %s662_s10  ;;  %s738_s1 = smov [#allocation8]  }
  0x54   : > { %s666_s12 = sshll.u32 %s738_s1, 4  ;;  %s667_s12 = int_to_ptr.vmem [resolvable:$false] %s666_s12 }
  0x55   : > { %p664_p5 = pnand %p663_p12, %p997_p4  ;;  %s668_s13 = scalar_lea.vmem %s667_s12, 64 }
  0x56   : > { %p669_p2 = scmp.lt.s32.totalorder %s939_s19, %s667_s12  ;;  %p670_p8 = scmp.lt.s32.totalorder %s668_s13, %s662_s10 }
  0x57   : > { %313 = vperm.xlu0 %611, %v287_v3   ;;  %p665_p13 = pneg %p664_p5 }
  0x58   : > { %p671_p10 = por %p670_p8, %p669_p2 }
  0x5a   : > { %p672_p11 = pnand %p671_p10, %p665_p13 }
  0xd2   : > { %v297_v10 = vpop.permute.xlu0 %296 }
  0xd3   : > { %v299_v12 = vadd.f32 %v297_v10, %v290_v5  ;;  %v300_v13 = vadd.f32 %v297_v10, %v291_v6 }
  0xd5   : > { %v308_v16 = vmul.f32 %v306_v11, %v300_v13  ;;  %v307_v17 = vmul.f32 %v306_v11, %v299_v12 }
  0xd6   : > { %v314_v21 = vpop.permute.xlu0 %313 }
  0xd7   : > { %v310_v18 = vadd.f32 %v308_v16, %v305_v14  ;;  %v309_v19 = vadd.f32 %v307_v17, %v304_v15 }
  0xd9   : > { %320 = vmatprep.subr.mxu0 %v310_v18 }
  0xda   : > { %321 = vmatpush1.msra.mxu0 %v309_v19 }
  0xdb   : > { %551 = vmatmul.mubr.msk.f32.vlgmr.msra.gmra.mrb[0].mxu0 %vm316_vm0, %v286_v20 }
 0x1ae   : > { %v386_v22 = vpop.f32.mrb[0].mxu0 }
 0x1af   : > { %v387_v23 = vadd.f32 %v386_v22, %v314_v21  ;;  %v388_v24 = vpop.f32.mrb[1].mxu0 }
 0x1b0   : > { %v389_v25 = vadd.f32 %v388_v24, %v314_v21 }
 0x1b1   : > { %v391_v26 = vsub.f32 %v387_v23, %v299_v12 }
 0x1b2   : > { %v392_v27 = vsub.f32 %v389_v25, %v300_v13 }
 0x1b3   : > { %v393_v28 = vmul.f32 %v391_v26, %v391_v26 }
 0x1b4   : > { %v394_v29 = vmul.f32 %v392_v27, %v392_v27 }
 0x1b5   : > { %v395_v30 = vrot.slane %v393_v28, 4 }
 0x1b6   : > { %v401_v31 = vrot.slane %v394_v29, 4 }
 0x1b7   : > { %v396_v32 = vadd.f32 %v395_v30, %v393_v28 }
 0x1b8   : > { %v402_v33 = vadd.f32 %v401_v31, %v394_v29 }
 0x1b9   : > { %v397_v37 = vrot.slane %v396_v32, 2 }
 0x1ba   : > { %v403_v38 = vrot.slane %v402_v33, 2 }
 0x1bb   : > { %v398_v39 = vadd.f32 %v397_v37, %v396_v32 }
 0x1bc   : > { %v404_v40 = vadd.f32 %v403_v38, %v402_v33 }
 0x1bd   : > { %v399_v43 = vrot.slane %v398_v39, 1 }
 0x1be   : > { %v405_v44 = vrot.slane %v404_v40, 1 }
 0x1bf   : > { %v400_v45 = vadd.f32 %v399_v43, %v398_v39 }
 0x1c0   : > { %v406_v46 = vadd.f32 %v405_v44, %v404_v40 }
 0x1c2   : > { %v409_v48 = vcombine.low %v400_v45, %v406_v46 }
 0x1c4   : > { %v416_v49 = vrot.slane %v409_v48, %v415_v47 }
 0x1c6   : > { %v423_v50 = vrot.slane %v416_v49, %v415_v47 }
 0x1c8   : > { %429 = vst.msk [vmem:[%s276_s18] sm:$0x3] %vm427_vm1, %v423_v50 }
 0x1c9   : > { %675 = shalt.err (!%p672_p11)
}
 0x1ca   : > { %s676_s16 = scalar_lea.hbm %s937_s11, 32  ;;  %s680_s24 = scalar_lea.hbm %s987_s7, 64 }
 0x1cb   : > { %p677_p0 = scmp.ne.s32.totalorder %s937_s11, %s676_s16  ;;  %p681_p7 = scmp.lt.u32.totalorder %s937_s11, %s987_s7 }
 0x1cc   : > { %p682_p9 = scmp.lt.u32.totalorder %s680_s24, %s676_s16  ;;  %p684_p12 = scmp.lt.u32.totalorder %s676_s16, %s937_s11 }
 0x1cd   : > { %p678_p1 = pnand %p677_p0, %p997_p4 }
 0x1ce   : > { %p683_p3 = por %p682_p9, %p681_p7 }
 0x1cf   : > { %p679_p6 = pneg %p678_p1 }
 0x1d0   : > { %p685_p5 = por %p684_p12, %p683_p3 }
 0x1d2   : > { %p686_p13 = pnand %p685_p5, %p679_p6 }
 0x1d4   : > { %689 = shalt.err (!%p686_p13)
}
 0x1d5   : > { %562 = dma.vmem_to_hbm [thread:$0]  (%p997_p4), %s939_s19, 32, %s937_s11, %s431_s30  }
 0x1d6 PF: > { %s457_s17 = sand.u32 1, %s718_s0   ;;  %p998_p2 = scmp.ne.s32.totalorder %s993_s9, 0 }
 0x1d7   : > { %p999_p8 = scmp.ge.s32.totalorder %s730_s23, 2  ;;  %s458_s18 = scalar_lea.sflag [#allocation7], %s457_s17 }
 0x1d9   : > { %p569_p10 = pnand %p999_p8, %p998_p2 }
 0x1db   : > { %713 = dma.done.wait (!%p569_p10), %s458_s18, 32  }
 0x1dc   : > { %715 = vsyncadd (!%p569_p10), %s458_s18, 4294967264  ;;  %p26_p11 = scmp.ge.s32.totalorder %s828_s25, 4   ;;  %s1000_s0 = smov %s722_s21 }
 0x1dd   : > { %s1001_s21 = smov %s726_s22  ;;  %s1002_s22 = smov %s840_s28 }
 0x1de   : > { %s1003_s23 = smov %s828_s25  ;;  %28 = sbr.rel (!%p26_p11) target bundleno = 24 (0x18), region = 91 }
 0x1e5   :  { %463 = vsyncpa [#allocation6], 1 }
 0x1e6   :  { %465 = vsyncpa [#allocation6 + $0x1], 1 }
 0x1e7   :  { %466 = vsyncpa [#allocation7], 1 }
 0x1e8   :  { %468 = vsyncpa [#allocation7 + $0x1], 1 }

</bundles_post_ra>
